<compile_context>
chip_gen: v6e
topology: v6e:2x2x1
jax: 0.10.0
libtpu: 0.0.40
codegen_flags: <defaults>
</compile_context>

<pallas_src>
import functools

import jax
import jax.numpy as jnp
from jax.experimental import pallas as pl
from jax.experimental.pallas import tpu as pltpu

_LANES = 128
_ACC_ROWS = 32  # accumulator sublane depth: 4 independent vadd chains


def _sq_err_kernel(x_ref, y_ref, o_ref, *, block_rows, steps_per_split,
                   n_rows, n_blocks, need_mask):
    i = pl.program_id(1)

    # Zero the resident per-split accumulator block on the first inner step.
    @pl.when(i == 0)
    def _():
        o_ref[...] = jnp.zeros_like(o_ref)

    d = x_ref[...].astype(jnp.float32) - y_ref[...].astype(jnp.float32)
    sq = d * d

    def accumulate(vals):
        # (block_rows, 128) -> (32, 128) via pure VPU vreg adds; 4 parallel
        # accumulation chains (one per (8,128) vreg of the output block).
        o_ref[...] += vals.reshape(
            block_rows // _ACC_ROWS, _ACC_ROWS, _LANES).sum(axis=0)

    if need_mask:
        # Nominal block index (un-clamped) so over-covered steps — whose
        # index_map was clamped to re-read a valid block — contribute zero.
        blk = pl.program_id(0) * steps_per_split + i

        # Bulk blocks: no mask, pure 2-vld / 3-VALU floor.
        @pl.when(blk < n_blocks - 1)
        def _():
            accumulate(sq)

        # Last nominal block (and any over-covered clamped step): mask every
        # row at/after n_rows so padded-block reads never leak in.
        @pl.when(blk >= n_blocks - 1)
        def _():
            rows = blk * block_rows + jax.lax.broadcasted_iota(
                jnp.int32, (block_rows, _LANES), 0)
            accumulate(jnp.where(rows < n_rows, sq, 0.0))
    else:
        accumulate(sq)


def abs_loss(x, y, *, block_rows=4096, num_splits=2):
    """Computes sum((x - y)**2) over all elements, matching AbsLoss.forward."""
    assert x.shape == y.shape, "x and y must have the same shape"

    total = 1
    for s in x.shape:
        total *= s

    main = (total // _LANES) * _LANES
    tail = jnp.float32(0.0)
    if main != total:
        # Ragged tail (< 128 elements): handled in plain JAX, negligible cost.
        xt = jnp.ravel(x)[main:].astype(jnp.float32)
        yt = jnp.ravel(y)[main:].astype(jnp.float32)
        tail = jnp.sum((xt - yt) ** 2)
    if main == 0:
        return tail

    if main == total:
        # Free reshape (no data movement) for contiguous, lane-divisible bulk.
        xf = x.reshape(main // _LANES, _LANES)
        yf = y.reshape(main // _LANES, _LANES)
    else:
        # TODO(synk): this slice+reshape copies ~the whole input; see header.
        xf = jnp.ravel(x)[:main].reshape(main // _LANES, _LANES)
        yf = jnp.ravel(y)[:main].reshape(main // _LANES, _LANES)

    n_rows = main // _LANES

    # block_rows: multiple of the accumulator depth, no bigger than needed.
    block_rows = max(_ACC_ROWS, min(block_rows,
                                    pl.cdiv(n_rows, _ACC_ROWS) * _ACC_ROWS))
    block_rows = pl.cdiv(block_rows, _ACC_ROWS) * _ACC_ROWS

    n_blocks = pl.cdiv(n_rows, block_rows)
    num_splits = max(1, min(num_splits, n_blocks))
    steps_per_split = pl.cdiv(n_blocks, num_splits)
    need_mask = (num_splits * steps_per_split * block_rows) != n_rows

    def in_idx(s, i):
        # Clamp so over-covered steps re-read a valid block (masked to zero).
        blk = jnp.minimum(s * steps_per_split + i, n_blocks - 1)
        return (blk, 0)

    kernel = functools.partial(
        _sq_err_kernel,
        block_rows=block_rows,
        steps_per_split=steps_per_split,
        n_rows=n_rows,
        n_blocks=n_blocks,
        need_mask=need_mask,
    )

    itemsize_in = xf.dtype.itemsize + yf.dtype.itemsize
    cost = pl.CostEstimate(
        flops=3 * main,                       # sub + mul + add per element
        transcendentals=0,
        bytes_accessed=itemsize_in * main + num_splits * _ACC_ROWS * _LANES * 4,
    )

    partials = pl.pallas_call(
        kernel,
        out_shape=jax.ShapeDtypeStruct((num_splits, _ACC_ROWS, _LANES),
                                       jnp.float32),
        grid_spec=pl.GridSpec(
            grid=(num_splits, steps_per_split),
            in_specs=[
                pl.BlockSpec((block_rows, _LANES), in_idx),
                pl.BlockSpec((block_rows, _LANES), in_idx),
            ],
            out_specs=pl.BlockSpec((None, _ACC_ROWS, _LANES),
                                   lambda s, i: (s, 0, 0)),
        ),
        compiler_params=pltpu.CompilerParams(
            dimension_semantics=("parallel", "arbitrary"),
            # 2 inputs x 2 buffers x 2 MiB = 8 MiB needed; 32 MiB gives ample
            # headroom and is safe on every generation (v5e default is 16 MiB).
            vmem_limit_bytes=32 * 1024 * 1024,
        ),
        cost_estimate=cost,
    )(xf, yf)

    # Single cheap cross-lane/sublane reduction on a tiny array.
    return jnp.sum(partials) + tail


if __name__ == "__main__":
    key = jax.random.PRNGKey(0)
    kx, ky = jax.random.split(key)
    # NCHW inputs, small shapes consistent with the module.
    x = jax.random.normal(kx, (2, 4, 16, 16), dtype=jnp.float32)
    y = jax.random.normal(ky, (2, 4, 16, 16), dtype=jnp.float32)

    loss = abs_loss(x, y)
    jax.block_until_ready(loss)

    # Reference check mirroring the PyTorch semantics.
    ref = jnp.sum(jnp.sum((x - y) ** 2, axis=1))
    assert jnp.allclose(loss, ref, rtol=1e-5, atol=1e-5), (loss, ref)

    print("KERNEL_OK")
</pallas_src>

<mosaic_0001>
module attributes {stable_mosaic.version = 11 : i64} {
  func.func @_sq_err_kernel(%arg0: i32, %arg1: i32, %arg2: memref<32x128xf32, #tpu.memory_space<vmem>>, %arg3: memref<32x128xf32, #tpu.memory_space<vmem>>, %arg4: memref<1x32x128xf32, #tpu.memory_space<vmem>>) attributes {dimension_semantics = [#tpu.dimension_semantics<parallel>, #tpu.dimension_semantics<arbitrary>], iteration_bounds = array<i64: 1, 1>, scalar_prefetch = 0 : i64, scratch_operands = 0 : i64, tpu.core_type = #tpu.core_type<tc>, window_params = [{transform_indices = @transform_0, window_bounds = array<i64: 32, 128>}, {transform_indices = @transform_1, window_bounds = array<i64: 32, 128>}, {transform_indices = @transform_2, window_bounds = array<i64: 1, 32, 128>}]} {
    %c0_i32 = arith.constant 0 : i32
    %0 = arith.cmpi eq, %arg1, %c0_i32 : i32
    %1 = arith.extui %0 : i1 to i32
    %c0_i32_0 = arith.constant 0 : i32
    %2 = arith.cmpi ne, %1, %c0_i32_0 : i32
    scf.if %2 {
      %cst = arith.constant 0.000000e+00 : f32
      %15 = vector.broadcast %cst : f32 to vector<32x128xf32>
      %c0_8 = arith.constant 0 : index
      %c0_9 = arith.constant 0 : index
      %c0_10 = arith.constant 0 : index
      %16 = vector.load %arg4[%c0_8, %c0_9, %c0_10] : memref<1x32x128xf32, #tpu.memory_space<vmem>>, vector<1x32x128xf32>
      %17 = vector.shape_cast %16 : vector<1x32x128xf32> to vector<32x128xf32>
      %18 = vector.shape_cast %15 : vector<32x128xf32> to vector<1x32x128xf32>
      tpu.vector_store %arg4[%c0_8, %c0_9, %c0_10], %18 {strides = array<i32>} : memref<1x32x128xf32, #tpu.memory_space<vmem>>, vector<1x32x128xf32>,
    } else {
    }
    %c0 = arith.constant 0 : index
    %c0_1 = arith.constant 0 : index
    %3 = vector.load %arg2[%c0, %c0_1] : memref<32x128xf32, #tpu.memory_space<vmem>>, vector<32x128xf32>
    %c0_2 = arith.constant 0 : index
    %c0_3 = arith.constant 0 : index
    %4 = vector.load %arg3[%c0_2, %c0_3] : memref<32x128xf32, #tpu.memory_space<vmem>>, vector<32x128xf32>
    %5 = arith.subf %3, %4 : vector<32x128xf32>
    %6 = arith.mulf %5, %5 : vector<32x128xf32>
    %c1_i32 = arith.constant 1 : i32
    %7 = arith.muli %arg0, %c1_i32 : i32
    %8 = arith.addi %7, %arg1 : i32
    %c0_i32_4 = arith.constant 0 : i32
    %9 = arith.cmpi slt, %8, %c0_i32_4 : i32
    %10 = arith.extui %9 : i1 to i32
    %c0_i32_5 = arith.constant 0 : i32
    %11 = arith.cmpi ne, %10, %c0_i32_5 : i32
    scf.if %11 {
      %c0_8 = arith.constant 0 : index
      %c0_9 = arith.constant 0 : index
      %c0_10 = arith.constant 0 : index
      %15 = vector.load %arg4[%c0_8, %c0_9, %c0_10] : memref<1x32x128xf32, #tpu.memory_space<vmem>>, vector<1x32x128xf32>
      %16 = vector.shape_cast %15 : vector<1x32x128xf32> to vector<32x128xf32>
      %17 = vector.shape_cast %6 : vector<32x128xf32> to vector<1x32x128xf32>
      %cst = arith.constant dense<0.000000e+00> : vector<32x128xf32>
      %18 = vector.multi_reduction <add>, %17, %cst [0] : vector<1x32x128xf32> to vector<32x128xf32>
      %19 = arith.addf %16, %18 : vector<32x128xf32>
      %c0_11 = arith.constant 0 : index
      %c0_12 = arith.constant 0 : index
      %c0_13 = arith.constant 0 : index
      %20 = vector.load %arg4[%c0_11, %c0_12, %c0_13] : memref<1x32x128xf32, #tpu.memory_space<vmem>>, vector<1x32x128xf32>
      %21 = vector.shape_cast %20 : vector<1x32x128xf32> to vector<32x128xf32>
      %22 = vector.shape_cast %19 : vector<32x128xf32> to vector<1x32x128xf32>
      tpu.vector_store %arg4[%c0_11, %c0_12, %c0_13], %22 {strides = array<i32>} : memref<1x32x128xf32, #tpu.memory_space<vmem>>, vector<1x32x128xf32>,
    } else {
    }
    %c0_i32_6 = arith.constant 0 : i32
    %12 = arith.cmpi sge, %8, %c0_i32_6 : i32
    %13 = arith.extui %12 : i1 to i32
    %c0_i32_7 = arith.constant 0 : i32
    %14 = arith.cmpi ne, %13, %c0_i32_7 : i32
    scf.if %14 {
      %c32_i32 = arith.constant 32 : i32
      %15 = arith.muli %8, %c32_i32 : i32
      %16 = tpu.iota {dimensions = array<i32: 0>} : vector<32x128xi32>
      %17 = vector.broadcast %15 : i32 to vector<32x128xi32>
      %18 = arith.addi %17, %16 : vector<32x128xi32>
      %c16_i32 = arith.constant 16 : i32
      %19 = vector.broadcast %c16_i32 : i32 to vector<32x128xi32>
      %20 = arith.cmpi slt, %18, %19 : vector<32x128xi32>
      %cst = arith.constant 0.000000e+00 : f32
      %21 = vector.broadcast %cst : f32 to vector<32x128xf32>
      %22 = arith.select %20, %6, %21 : vector<32x128xi1>, vector<32x128xf32>
      %c0_8 = arith.constant 0 : index
      %c0_9 = arith.constant 0 : index
      %c0_10 = arith.constant 0 : index
      %23 = vector.load %arg4[%c0_8, %c0_9, %c0_10] : memref<1x32x128xf32, #tpu.memory_space<vmem>>, vector<1x32x128xf32>
      %24 = vector.shape_cast %23 : vector<1x32x128xf32> to vector<32x128xf32>
      %25 = vector.shape_cast %22 : vector<32x128xf32> to vector<1x32x128xf32>
      %cst_11 = arith.constant dense<0.000000e+00> : vector<32x128xf32>
      %26 = vector.multi_reduction <add>, %25, %cst_11 [0] : vector<1x32x128xf32> to vector<32x128xf32>
      %27 = arith.addf %24, %26 : vector<32x128xf32>
      %c0_12 = arith.constant 0 : index
      %c0_13 = arith.constant 0 : index
      %c0_14 = arith.constant 0 : index
      %28 = vector.load %arg4[%c0_12, %c0_13, %c0_14] : memref<1x32x128xf32, #tpu.memory_space<vmem>>, vector<1x32x128xf32>
      %29 = vector.shape_cast %28 : vector<1x32x128xf32> to vector<32x128xf32>
      %30 = vector.shape_cast %27 : vector<32x128xf32> to vector<1x32x128xf32>
      tpu.vector_store %arg4[%c0_12, %c0_13, %c0_14], %30 {strides = array<i32>} : memref<1x32x128xf32, #tpu.memory_space<vmem>>, vector<1x32x128xf32>,
    } else {
    }
    return
  }
  func.func @transform_0(%arg0: i32, %arg1: i32) -> (i32, i32) {
    %c1_i32 = arith.constant 1 : i32
    %0 = arith.muli %arg0, %c1_i32 : i32
    %1 = arith.addi %0, %arg1 : i32
    %c0_i32 = arith.constant 0 : i32
    %2 = arith.minsi %1, %c0_i32 : i32
    %c0_i32_0 = arith.constant 0 : i32
    %c0_i32_1 = arith.constant 0 : i32
    return %2, %c0_i32_0 : i32, i32
  }
  func.func @transform_1(%arg0: i32, %arg1: i32) -> (i32, i32) {
    %c1_i32 = arith.constant 1 : i32
    %0 = arith.muli %arg0, %c1_i32 : i32
    %1 = arith.addi %0, %arg1 : i32
    %c0_i32 = arith.constant 0 : i32
    %2 = arith.minsi %1, %c0_i32 : i32
    %c0_i32_0 = arith.constant 0 : i32
    %c0_i32_1 = arith.constant 0 : i32
    return %2, %c0_i32_0 : i32, i32
  }
  func.func @transform_2(%arg0: i32, %arg1: i32) -> (i32, i32, i32) {
    %c0_i32 = arith.constant 0 : i32
    %c0_i32_0 = arith.constant 0 : i32
    %c0_i32_1 = arith.constant 0 : i32
    return %arg0, %c0_i32, %c0_i32_0 : i32, i32, i32
  }
}

</mosaic_0001>

<bundles_post_ra>
// kernel: tpu_custom_call.1
= control target key start
LH: loop header
LB: loop body
LE: loop exit
PB: predicated region body
PF: predicated region fallthrough
CT: control target
= control target key end

     0   :  { %7 = vsyncpa [#allocation3], 0  ;;  %s289_s0 = inlined_call_operand.hbm [shape: f32[16,128], index: 0, kind: input, shape index: {}]   ;;  %s290_s1 = inlined_call_operand.hbm [shape: f32[16,128], index: 1, kind: input, shape index: {}]   ;;  %s291_s2 = inlined_call_operand.hbm [shape: f32[1,32,128], index: 2, kind: output, shape index: {}]  }
   0x1   :  { %8 = vsyncpa [#allocation6], 0 }
   0x2   :  { %9 = vsyncpa [#allocation4], 0 }
   0x3   :  { %20 = vsyncadd [#allocation3], 256  ;;  %s250_s9 = smov [#allocation2]  }
   0x4   :  { %s25_s10 = sshll.u32 %s250_s9, 4  ;;  %s26_s10 = int_to_ptr.vmem [resolvable:$true] %s25_s10 }
   0x5   :  { %s192_s11 = scalar_lea.vmem %s26_s10, 256  ;;  %s196_s12 = scalar_lea.vmem %s26_s10, 512 }
   0x6   :  { %p193_p0 = scmp.ne.s32.totalorder %s26_s10, %s192_s11  ;;  %p197_p1 = scmp.lt.s32.totalorder %s26_s10, %s26_s10 }
   0x7   :  { %p198_p2 = scmp.lt.s32.totalorder %s196_s12, %s192_s11 }
   0x9   :  { %p199_p3 = por %p198_p2, %p197_p1 }
   0xb   :  { %p200_p4 = pnand %p199_p3, %p193_p0 }
   0xd   :  { %203 = shalt.err (!%p200_p4)
}
   0xe   :  { %s251_s13 = smov 128   ;;  %s252_s14 = smov 8  }
   0xf   :  { %31 = dma.hbm_to_vmem [thread:$0]  %s289_s0, 256, %s26_s10, [#allocation3], %s251_s13, %s251_s13, %s252_s14  }
  0x10   :  { %42 = vsyncadd [#allocation6], 256  ;;  %s253_s17 = smov [#allocation5]  }
  0x11   :  { %s47_s18 = sshll.u32 %s253_s17, 4  ;;  %s48_s18 = int_to_ptr.vmem [resolvable:$true] %s47_s18 }
  0x12   :  { %s212_s19 = scalar_lea.vmem %s48_s18, 256  ;;  %s216_s20 = scalar_lea.vmem %s48_s18, 512 }
  0x13   :  { %p213_p5 = scmp.ne.s32.totalorder %s48_s18, %s212_s19  ;;  %p217_p6 = scmp.lt.s32.totalorder %s48_s18, %s48_s18 }
  0x14   :  { %p218_p7 = scmp.lt.s32.totalorder %s216_s20, %s212_s19 }
  0x16   :  { %p219_p8 = por %p218_p7, %p217_p6 }
  0x18   :  { %p220_p9 = pnand %p219_p8, %p213_p5 }
  0x1a   :  { %223 = shalt.err (!%p220_p9)
}
  0x1b   :  { %53 = dma.hbm_to_vmem [thread:$0]  %s290_s1, 256, %s48_s18, [#allocation6], %s251_s13, %s251_s13, %s252_s14  }
  0x1c   :  { %244 = dma.done.wait [#allocation3], 512  }
  0x1d   :  { %245 = vsyncadd [#allocation3], 4294966784 }
  0x1e   :  { %246 = dma.done.wait [#allocation6], 512  }
  0x1f   :  { %247 = vsyncadd [#allocation6], 4294966784  ;;  %v254_v0 = vmov 0.0   ;;  %v80_v1 = vld [vmem:[#allocation2] sm:$0xff]  ;;  %v81_v3 = vld [vmem:[#allocation2 + $0x8] sm:$0xff]  ;;  %s255_s0 = smov [#allocation7]  }
  0x20   :  { %154 = vst [vmem:[#allocation7 + $0x10] sm:$0xff] %v254_v0  ;;  %155 = vst [vmem:[#allocation7 + $0x18] sm:$0xff] %v254_v0  ;;  %v84_v2 = vld [vmem:[#allocation5] sm:$0xff]  ;;  %v85_v5 = vld [vmem:[#allocation5 + $0x8] sm:$0xff]  ;;  %s161_s23 = sshll.u32 %s255_s0, 4  ;;  %s162_s23 = int_to_ptr.vmem [resolvable:$true] %s161_s23 }
  0x21   :  { %v88_v4 = vsub.f32 %v80_v1, %v84_v2  ;;  %v89_v6 = vsub.f32 %v81_v3, %v85_v5  ;;  %s224_s1 = scalar_lea.vmem %s162_s23, 512  ;;  %p229_p11 = scmp.lt.s32.totalorder %s162_s23, %s162_s23 }
  0x22   :  { %p225_p10 = scmp.ne.s32.totalorder %s162_s23, %s224_s1  ;;  %p230_p12 = scmp.lt.s32.totalorder %s224_s1, %s224_s1 }
  0x23   :  { %v92_v7 = vmul.f32 %v88_v4, %v88_v4  ;;  %v93_v8 = vmul.f32 %v89_v6, %v89_v6 }
  0x24   :  { %p231_p13 = por %p230_p12, %p229_p11 }
  0x25   :  { %152 = vst [vmem:[#allocation7] sm:$0xff] %v92_v7  ;;  %153 = vst [vmem:[#allocation7 + $0x8] sm:$0xff] %v93_v8 }
  0x26   :  { %p232_p0 = pnand %p231_p13, %p225_p10 }
  0x28   :  { %235 = shalt.err (!%p232_p0)
}
  0x29   :  { %167 = dma.vmem_to_hbm [thread:$0]  %s162_s23, 512, %s291_s2, [#allocation4], %s251_s13, %s251_s13, %s252_s14  }
  0x2a   :  { %248 = dma.done.wait [#allocation4], 512  }
  0x2b   :  { %249 = vsyncadd [#allocation4], 4294966784 }
  0x2c   :  { %171 = vsyncpa [#allocation3], 1 }
  0x2d   :  { %172 = vsyncpa [#allocation6], 1 }
  0x2e   :  { %173 = vsyncpa [#allocation4], 1 }

</bundles_post_ra>
